<compile_context>
chip_gen: v6e
topology: v6e:2x2x1
jax: 0.10.0
libtpu: 0.0.40
codegen_flags: <defaults>
</compile_context>

<pallas_src>
import functools

import jax
import jax.numpy as jnp
from jax.experimental import pallas as pl
from jax.experimental.pallas import tpu as pltpu


def _round_up(x, m):
    return (x + m - 1) // m * m


def _cdiv(a, b):
    return (a + b - 1) // b


def _vmem_capacity_bytes():
    try:
        return int(pltpu.get_tpu_info().vmem_capacity_bytes)
    except Exception:
        return 64 * 1024 * 1024  # conservative (v7x per-TensorCore size)


def _choose_tile_n(n, row_bytes, fixed_bytes, budget_bytes):
    """Largest multiple-of-8 row tile whose (double-buffered) blocks fit the VMEM budget,
    capped so the batch grid has >= 2 steps whenever possible (keeps both v7x TensorCores
    busy on the "parallel" axis and gives the pipeline something to overlap)."""
    avail = max(budget_bytes - fixed_bytes, 8 * row_bytes)
    tile = max(8, (avail // max(row_bytes, 1)) // 8 * 8)
    tile = min(tile, _round_up(n, 8))
    if n > 8:
        tile = min(tile, max(8, _round_up(_cdiv(n, 2), 8)))
    return int(tile)


# ----------------------------------------------------------------------------- phase 1
def _pool_linear_relu_repl_kernel(n_valid, neigh_ref, self_ref, wr_ref, ws_ref, b_ref,
                                  h_ref, stats_ref):
    """neigh_ref: (tile_n, S*D).  Neighbor mean is folded into the replicated weight wr,
    so pooling + linear is a single MXU matmul."""
    tile_n = h_ref.shape[0]
    xn = neigh_ref[...].astype(wr_ref.dtype)                            # (tile_n, S*D)
    xs = self_ref[...].astype(ws_ref.dtype)                             # (tile_n, D)
    h = (jnp.dot(xn, wr_ref[...], preferred_element_type=jnp.float32)
         + jnp.dot(xs, ws_ref[...], preferred_element_type=jnp.float32)
         + b_ref[...])                                                  # (tile_n, O_pad) f32
    h = jnp.maximum(h, 0.0)                                             # ReLU
    h_ref[...] = h.astype(h_ref.dtype)

    # BatchNorm partial statistics; mask rows past the real batch size.
    row = (pl.program_id(0) * tile_n
           + jax.lax.broadcasted_iota(jnp.int32, (tile_n, 1), 0))
    hv = jnp.where(row < n_valid, h, 0.0)
    s = jnp.sum(hv, axis=0, keepdims=True)                              # (1, O_pad)
    sq = jnp.sum(hv * hv, axis=0, keepdims=True)                        # (1, O_pad)
    stats_ref[0, 0:1, :] = s
    stats_ref[0, 1:2, :] = sq


def _pool_linear_relu_sum_kernel(n_valid, neigh_ref, self_ref, wn_ref, ws_ref, b_ref,
                                 h_ref, stats_ref):
    """Fallback (replicated weight too large for VMEM): neigh_ref (tile_n, S, D),
    neighbor mean done as a sum over the support axis (1/S already folded into wn)."""
    tile_n = h_ref.shape[0]
    xn = jnp.sum(neigh_ref[...], axis=1).astype(wn_ref.dtype)           # (tile_n, D)
    xs = self_ref[...].astype(ws_ref.dtype)
    h = (jnp.dot(xn, wn_ref[...], preferred_element_type=jnp.float32)
         + jnp.dot(xs, ws_ref[...], preferred_element_type=jnp.float32)
         + b_ref[...])
    h = jnp.maximum(h, 0.0)
    h_ref[...] = h.astype(h_ref.dtype)

    row = (pl.program_id(0) * tile_n
           + jax.lax.broadcasted_iota(jnp.int32, (tile_n, 1), 0))
    hv = jnp.where(row < n_valid, h, 0.0)
    s = jnp.sum(hv, axis=0, keepdims=True)
    sq = jnp.sum(hv * hv, axis=0, keepdims=True)
    stats_ref[0, 0:1, :] = s
    stats_ref[0, 1:2, :] = sq


# ----------------------------------------------------------------------------- phase 2
def _bn_apply_kernel(h_ref, scale_ref, shift_ref, out_ref):
    out_ref[...] = (h_ref[...].astype(jnp.float32) * scale_ref[...]
                    + shift_ref[...]).astype(out_ref.dtype)


# ----------------------------------------------------------------------------- wrapper
def pool_aggregator_forward(self_vecs, neigh_vecs, weight, bias, gamma, beta,
                            eps=1e-5, compute_dtype=jnp.bfloat16, h_dtype=jnp.bfloat16):
    """self_vecs (N, D), neigh_vecs (N, S, D), weight (2*D, O) [torch Linear weight.T],
    bias/gamma/beta (1, O) or (O,)  ->  (N, O) float32."""
    N, D = self_vecs.shape
    _, S, _ = neigh_vecs.shape
    O = weight.shape[1]

    f32 = jnp.float32
    O_pad = _round_up(O, 128)                       # lane-dense output axis
    c_bytes = jnp.dtype(compute_dtype).itemsize
    h_bytes = jnp.dtype(h_dtype).itemsize
    x_bytes = 4                                     # inputs streamed as f32

    # Parameter prep (small): split torch's (2D, O) weight, fold 1/S, pad O, cast.
    w_neigh = jnp.pad(weight[:D].astype(f32) / S, ((0, 0), (0, O_pad - O)))     # (D, O_pad)
    w_self = jnp.pad(weight[D:].astype(f32), ((0, 0), (0, O_pad - O))).astype(compute_dtype)
    b_p = jnp.pad(bias.reshape(1, O).astype(f32), ((0, 0), (0, O_pad - O)))
    gamma_p = jnp.pad(gamma.reshape(-1).astype(f32), (0, O_pad - O))
    beta_p = jnp.pad(beta.reshape(-1).astype(f32), (0, O_pad - O))

    self_f = self_vecs.astype(f32)
    neigh_f = neigh_vecs.astype(f32)

    # Per-chip tiling budget (v5e/v6e: 128 MiB VMEM, v7x: 64 MiB per TensorCore).
    vmem_cap = _vmem_capacity_bytes()
    budget = vmem_cap // 2
    vmem_limit = min(int(vmem_cap * 0.78), 100 * 1024 * 1024)
    cparams = pltpu.CompilerParams(dimension_semantics=("parallel",),
                                   vmem_limit_bytes=vmem_limit)

    # Prefer folding the pooling into the MXU via a replicated weight when it fits VMEM.
    use_repl = (S * D * O_pad * c_bytes) <= 4 * 1024 * 1024
    if use_repl:
        w_big = jnp.tile(w_neigh, (S, 1)).astype(compute_dtype)        # (S*D, O_pad)
        neigh_in = neigh_f.reshape(N, S * D)                           # free row-major view
        kernel = functools.partial(_pool_linear_relu_repl_kernel, N)
        w_fixed = S * D * O_pad * c_bytes
    else:
        w_big = w_neigh.astype(compute_dtype)                          # (D, O_pad)
        neigh_in = neigh_f
        kernel = functools.partial(_pool_linear_relu_sum_kernel, N)
        w_fixed = D * O_pad * c_bytes

    row_bytes = 2 * (S * D * x_bytes + D * x_bytes + O_pad * h_bytes)  # double-buffered
    fixed = 2 * (w_fixed + D * O_pad * c_bytes + O_pad * 4 + 2 * 8 * O_pad * 4) + (2 << 20)
    tile_n = _choose_tile_n(N, row_bytes, fixed, budget)
    num_tiles = _cdiv(N, tile_n)                                       # no N padding

    if use_repl:
        neigh_spec = pl.BlockSpec((tile_n, S * D), lambda i: (i, 0))
        w_big_spec = pl.BlockSpec((S * D, O_pad), lambda i: (0, 0))
    else:
        neigh_spec = pl.BlockSpec((tile_n, S, D), lambda i: (i, 0, 0))
        w_big_spec = pl.BlockSpec((D, O_pad), lambda i: (0, 0))

    # ---- phase 1: pooled-concat linear + ReLU, plus packed per-tile BN partial sums ----
    h, stats = pl.pallas_call(
        kernel,
        out_shape=(
            jax.ShapeDtypeStruct((N, O_pad), h_dtype),
            jax.ShapeDtypeStruct((num_tiles, 2, O_pad), f32),
        ),
        grid=(num_tiles,),
        in_specs=[
            neigh_spec,                                          # neigh tile (pipelined)
            pl.BlockSpec((tile_n, D), lambda i: (i, 0)),         # self tile
            w_big_spec,                                          # pooled weight (resident)
            pl.BlockSpec((D, O_pad), lambda i: (0, 0)),          # w_self  (resident)
            pl.BlockSpec((1, O_pad), lambda i: (0, 0)),          # bias    (resident)
        ],
        out_specs=[
            pl.BlockSpec((tile_n, O_pad), lambda i: (i, 0)),
            pl.BlockSpec((1, 2, O_pad), lambda i: (i, 0, 0)),
        ],
        compiler_params=cparams,
    )(neigh_in, self_f, w_big, w_self, b_p)

    # ---- global BatchNorm statistics (tiny jnp reduction over num_tiles) ----
    col_sum = jnp.sum(stats[:, 0, :], axis=0)                   # (O_pad,)
    col_sumsq = jnp.sum(stats[:, 1, :], axis=0)                 # (O_pad,)
    mean = col_sum / N
    var = jnp.maximum(col_sumsq / N - mean * mean, 0.0)         # biased variance
    inv = jax.lax.rsqrt(var + eps)
    scale = (gamma_p * inv).reshape(1, O_pad)
    shift = (beta_p - mean * gamma_p * inv).reshape(1, O_pad)

    # ---- phase 2: apply normalization (independently sized, larger row tile) ----
    row2 = 2 * (O_pad * h_bytes + O_pad * 4)
    tile_n2 = _choose_tile_n(N, row2, 4 * 2 * O_pad * 4 + (1 << 20), budget)
    num_tiles2 = _cdiv(N, tile_n2)

    out_p = pl.pallas_call(
        _bn_apply_kernel,
        out_shape=jax.ShapeDtypeStruct((N, O_pad), f32),
        grid=(num_tiles2,),
        in_specs=[
            pl.BlockSpec((tile_n2, O_pad), lambda i: (i, 0)),
            pl.BlockSpec((1, O_pad), lambda i: (0, 0)),
            pl.BlockSpec((1, O_pad), lambda i: (0, 0)),
        ],
        out_specs=pl.BlockSpec((tile_n2, O_pad), lambda i: (i, 0)),
        compiler_params=cparams,
    )(h, scale, shift)

    return out_p[:, :O]


# ----------------------------------------------------------------------------- reference
def reference_forward(self_vecs, neigh_vecs, weight, bias, gamma, beta):
    neigh_mean = jnp.mean(neigh_vecs, axis=1)
    concat = jnp.concatenate([neigh_mean, self_vecs], axis=1)
    h = concat @ weight + bias
    h = jnp.maximum(h, 0.0)
    mean = jnp.mean(h, axis=0, keepdims=True)
    var = jnp.mean((h - mean) ** 2, axis=0, keepdims=True)
    return (h - mean) * jax.lax.rsqrt(var + 1e-5) * gamma.reshape(1, -1) + beta.reshape(1, -1)


if __name__ == "__main__":
    # Small deterministic example: batch N=60 (exercises the partial last tile),
    # support S=8, D=32, O=32.
    N, S, D, O = 60, 8, 32, 32
    key = jax.random.PRNGKey(0)
    k_self, k_neigh, k_w, k_b = jax.random.split(key, 4)

    self_vecs = jax.random.normal(k_self, (N, D), dtype=jnp.float32)
    neigh_vecs = jax.random.normal(k_neigh, (N, S, D), dtype=jnp.float32)

    # nn.Linear(2*D, O) default init: U(-1/sqrt(2D), 1/sqrt(2D)); stored as (2D, O) = W.T.
    bound = 1.0 / jnp.sqrt(jnp.float32(2 * D))
    weight = jax.random.uniform(k_w, (2 * D, O), jnp.float32, -bound, bound)
    bias = jax.random.uniform(k_b, (1, O), jnp.float32, -bound, bound)

    # BatchNorm1d default affine params.
    gamma = jnp.ones((1, O), jnp.float32)
    beta = jnp.zeros((1, O), jnp.float32)

    ref = reference_forward(self_vecs, neigh_vecs, weight, bias, gamma, beta)

    # Default (fast) path: bf16 matmul operands + bf16 h intermediate.
    fwd = jax.jit(pool_aggregator_forward)
    out = jax.block_until_ready(fwd(self_vecs, neigh_vecs, weight, bias, gamma, beta))
    assert out.shape == (N, O)
    assert out.dtype == jnp.float32
    assert jnp.allclose(out, ref, atol=5e-2, rtol=5e-2)

    # Full-f32 path: verifies kernel structure at tight tolerance.
    fwd_f32 = jax.jit(functools.partial(pool_aggregator_forward,
                                        compute_dtype=jnp.float32, h_dtype=jnp.float32))
    out32 = jax.block_until_ready(fwd_f32(self_vecs, neigh_vecs, weight, bias, gamma, beta))
    assert jnp.allclose(out32, ref, atol=1e-4, rtol=1e-4)

    print("KERNEL_OK")
</pallas_src>

<mosaic_0001>
module attributes {stable_mosaic.version = 11 : i64} {
  func.func @_pool_linear_relu_repl_kernel(%arg0: i32, %arg1: memref<32x256xf32, #tpu.memory_space<vmem>>, %arg2: memref<32x32xf32, #tpu.memory_space<vmem>>, %arg3: memref<256x128xbf16, #tpu.memory_space<vmem>>, %arg4: memref<32x128xbf16, #tpu.memory_space<vmem>>, %arg5: memref<1x128xf32, #tpu.memory_space<vmem>>, %arg6: memref<32x128xbf16, #tpu.memory_space<vmem>>, %arg7: memref<1x2x128xf32, #tpu.memory_space<vmem>>) attributes {dimension_semantics = [#tpu.dimension_semantics<parallel>], iteration_bounds = array<i64: 2>, scalar_prefetch = 0 : i64, scratch_operands = 0 : i64, tpu.core_type = #tpu.core_type<tc>, window_params = [{transform_indices = @transform_0, window_bounds = array<i64: 32, 256>}, {transform_indices = @transform_1, window_bounds = array<i64: 32, 32>}, {pipeline_mode = #tpu.pipeline_mode<synchronous>, transform_indices = @transform_2, window_bounds = array<i64: 256, 128>}, {pipeline_mode = #tpu.pipeline_mode<synchronous>, transform_indices = @transform_3, window_bounds = array<i64: 32, 128>}, {pipeline_mode = #tpu.pipeline_mode<synchronous>, transform_indices = @transform_4, window_bounds = array<i64: 1, 128>}, {transform_indices = @transform_5, window_bounds = array<i64: 32, 128>}, {transform_indices = @transform_6, window_bounds = array<i64: 1, 2, 128>}]} {
    %c0 = arith.constant 0 : index
    %c0_0 = arith.constant 0 : index
    %0 = vector.load %arg1[%c0, %c0_0] : memref<32x256xf32, #tpu.memory_space<vmem>>, vector<32x256xf32>
    %1 = arith.truncf %0 : vector<32x256xf32> to vector<32x256xbf16>
    %c0_1 = arith.constant 0 : index
    %c0_2 = arith.constant 0 : index
    %2 = vector.load %arg2[%c0_1, %c0_2] : memref<32x32xf32, #tpu.memory_space<vmem>>, vector<32x32xf32>
    %3 = arith.truncf %2 : vector<32x32xf32> to vector<32x32xbf16>
    %c0_3 = arith.constant 0 : index
    %c0_4 = arith.constant 0 : index
    %4 = vector.load %arg3[%c0_3, %c0_4] : memref<256x128xbf16, #tpu.memory_space<vmem>>, vector<256x128xbf16>
    %cst = arith.constant dense<0.000000e+00> : vector<32x128xf32>
    %5 = tpu.matmul %1, %4, %cst {dimension_numbers = #tpu.dot_dimension_numbers<[1], [0], [0], [1], [0, 0, 1, 1], [], []>} : vector<32x256xbf16>, vector<256x128xbf16>, vector<32x128xf32> -> vector<32x128xf32>
    %c0_5 = arith.constant 0 : index
    %c0_6 = arith.constant 0 : index
    %6 = vector.load %arg4[%c0_5, %c0_6] : memref<32x128xbf16, #tpu.memory_space<vmem>>, vector<32x128xbf16>
    %cst_7 = arith.constant dense<0.000000e+00> : vector<32x128xf32>
    %7 = tpu.matmul %3, %6, %cst_7 {dimension_numbers = #tpu.dot_dimension_numbers<[1], [0], [0], [1], [0, 0, 1, 1], [], []>} : vector<32x32xbf16>, vector<32x128xbf16>, vector<32x128xf32> -> vector<32x128xf32>
    %8 = arith.addf %5, %7 : vector<32x128xf32>
    %c0_8 = arith.constant 0 : index
    %c0_9 = arith.constant 0 : index
    %9 = vector.load %arg5[%c0_8, %c0_9] : memref<1x128xf32, #tpu.memory_space<vmem>>, vector<1x128xf32>
    %10 = vector.broadcast %9 : vector<1x128xf32> to vector<32x128xf32>
    %11 = arith.addf %8, %10 : vector<32x128xf32>
    %cst_10 = arith.constant 0.000000e+00 : f32
    %12 = vector.broadcast %cst_10 : f32 to vector<32x128xf32>
    %13 = arith.maximumf %11, %12 : vector<32x128xf32>
    %14 = arith.truncf %13 : vector<32x128xf32> to vector<32x128xbf16>
    %c0_11 = arith.constant 0 : index
    %c0_12 = arith.constant 0 : index
    %15 = vector.load %arg6[%c0_11, %c0_12] : memref<32x128xbf16, #tpu.memory_space<vmem>>, vector<32x128xbf16>
    tpu.vector_store %arg6[%c0_11, %c0_12], %14 {strides = array<i32>} : memref<32x128xbf16, #tpu.memory_space<vmem>>, vector<32x128xbf16>,
    %c32_i32 = arith.constant 32 : i32
    %16 = arith.muli %arg0, %c32_i32 : i32
    %17 = tpu.iota {dimensions = array<i32: 0>} : vector<32x1xi32>
    %18 = vector.broadcast %16 : i32 to vector<32x1xi32>
    %19 = arith.addi %18, %17 : vector<32x1xi32>
    %c60_i32 = arith.constant 60 : i32
    %20 = vector.broadcast %c60_i32 : i32 to vector<32x1xi32>
    %21 = arith.cmpi slt, %19, %20 : vector<32x1xi32>
    %cst_13 = arith.constant 0.000000e+00 : f32
    %22 = vector.shape_cast %21 : vector<32x1xi1> to vector<32x1xi1>
    %23 = vector.broadcast %22 : vector<32x1xi1> to vector<32x128xi1>
    %24 = vector.broadcast %cst_13 : f32 to vector<32x128xf32>
    %25 = arith.select %23, %13, %24 : vector<32x128xi1>, vector<32x128xf32>
    %cst_14 = arith.constant dense<0.000000e+00> : vector<128xf32>
    %26 = vector.multi_reduction <add>, %25, %cst_14 [0] : vector<32x128xf32> to vector<128xf32>
    %27 = vector.shape_cast %26 : vector<128xf32> to vector<1x128xf32>
    %28 = arith.mulf %25, %25 : vector<32x128xf32>
    %cst_15 = arith.constant dense<0.000000e+00> : vector<128xf32>
    %29 = vector.multi_reduction <add>, %28, %cst_15 [0] : vector<32x128xf32> to vector<128xf32>
    %30 = vector.shape_cast %29 : vector<128xf32> to vector<1x128xf32>
    %c0_16 = arith.constant 0 : index
    %c0_17 = arith.constant 0 : index
    %c0_18 = arith.constant 0 : index
    %31 = vector.load %arg7[%c0_16, %c0_17, %c0_18] : memref<1x2x128xf32, #tpu.memory_space<vmem>>, vector<1x1x128xf32>
    %32 = vector.shape_cast %31 : vector<1x1x128xf32> to vector<1x128xf32>
    %33 = vector.shape_cast %27 : vector<1x128xf32> to vector<1x1x128xf32>
    tpu.vector_store %arg7[%c0_16, %c0_17, %c0_18], %33 {strides = array<i32>} : memref<1x2x128xf32, #tpu.memory_space<vmem>>, vector<1x1x128xf32>,
    %c0_19 = arith.constant 0 : index
    %c1 = arith.constant 1 : index
    %c0_20 = arith.constant 0 : index
    %34 = vector.load %arg7[%c0_19, %c1, %c0_20] : memref<1x2x128xf32, #tpu.memory_space<vmem>>, vector<1x1x128xf32>
    %35 = vector.shape_cast %34 : vector<1x1x128xf32> to vector<1x128xf32>
    %36 = vector.shape_cast %30 : vector<1x128xf32> to vector<1x1x128xf32>
    tpu.vector_store %arg7[%c0_19, %c1, %c0_20], %36 {strides = array<i32>} : memref<1x2x128xf32, #tpu.memory_space<vmem>>, vector<1x1x128xf32>,
    return
  }
  func.func @transform_0(%arg0: i32) -> (i32, i32) {
    %c0_i32 = arith.constant 0 : i32
    %c0_i32_0 = arith.constant 0 : i32
    return %arg0, %c0_i32 : i32, i32
  }
  func.func @transform_1(%arg0: i32) -> (i32, i32) {
    %c0_i32 = arith.constant 0 : i32
    %c0_i32_0 = arith.constant 0 : i32
    return %arg0, %c0_i32 : i32, i32
  }
  func.func @transform_2(%arg0: i32) -> (i32, i32) {
    %c0_i32 = arith.constant 0 : i32
    %c0_i32_0 = arith.constant 0 : i32
    %c0_i32_1 = arith.constant 0 : i32
    return %c0_i32, %c0_i32_0 : i32, i32
  }
  func.func @transform_3(%arg0: i32) -> (i32, i32) {
    %c0_i32 = arith.constant 0 : i32
    %c0_i32_0 = arith.constant 0 : i32
    %c0_i32_1 = arith.constant 0 : i32
    return %c0_i32, %c0_i32_0 : i32, i32
  }
  func.func @transform_4(%arg0: i32) -> (i32, i32) {
    %c0_i32 = arith.constant 0 : i32
    %c0_i32_0 = arith.constant 0 : i32
    %c0_i32_1 = arith.constant 0 : i32
    return %c0_i32, %c0_i32_0 : i32, i32
  }
  func.func @transform_5(%arg0: i32) -> (i32, i32) {
    %c0_i32 = arith.constant 0 : i32
    %c0_i32_0 = arith.constant 0 : i32
    return %arg0, %c0_i32 : i32, i32
  }
  func.func @transform_6(%arg0: i32) -> (i32, i32, i32) {
    %c0_i32 = arith.constant 0 : i32
    %c0_i32_0 = arith.constant 0 : i32
    %c0_i32_1 = arith.constant 0 : i32
    return %arg0, %c0_i32, %c0_i32_0 : i32, i32, i32
  }
}

module attributes {stable_mosaic.version = 11 : i64} {
  func.func @_bn_apply_kernel(%arg0: i32, %arg1: memref<32x128xbf16, #tpu.memory_space<vmem>>, %arg2: memref<1x128xf32, #tpu.memory_space<vmem>>, %arg3: memref<1x128xf32, #tpu.memory_space<vmem>>, %arg4: memref<32x128xf32, #tpu.memory_space<vmem>>) attributes {dimension_semantics = [#tpu.dimension_semantics<parallel>], iteration_bounds = array<i64: 2>, scalar_prefetch = 0 : i64, scratch_operands = 0 : i64, tpu.core_type = #tpu.core_type<tc>, window_params = [{transform_indices = @transform_0, window_bounds = array<i64: 32, 128>}, {pipeline_mode = #tpu.pipeline_mode<synchronous>, transform_indices = @transform_1, window_bounds = array<i64: 1, 128>}, {pipeline_mode = #tpu.pipeline_mode<synchronous>, transform_indices = @transform_2, window_bounds = array<i64: 1, 128>}, {transform_indices = @transform_3, window_bounds = array<i64: 32, 128>}]} {
    %c0 = arith.constant 0 : index
    %c0_0 = arith.constant 0 : index
    %0 = vector.load %arg1[%c0, %c0_0] : memref<32x128xbf16, #tpu.memory_space<vmem>>, vector<32x128xbf16>
    %1 = arith.extf %0 : vector<32x128xbf16> to vector<32x128xf32>
    %c0_1 = arith.constant 0 : index
    %c0_2 = arith.constant 0 : index
    %2 = vector.load %arg2[%c0_1, %c0_2] : memref<1x128xf32, #tpu.memory_space<vmem>>, vector<1x128xf32>
    %3 = vector.broadcast %2 : vector<1x128xf32> to vector<32x128xf32>
    %4 = arith.mulf %1, %3 : vector<32x128xf32>
    %c0_3 = arith.constant 0 : index
    %c0_4 = arith.constant 0 : index
    %5 = vector.load %arg3[%c0_3, %c0_4] : memref<1x128xf32, #tpu.memory_space<vmem>>, vector<1x128xf32>
    %6 = vector.broadcast %5 : vector<1x128xf32> to vector<32x128xf32>
    %7 = arith.addf %4, %6 : vector<32x128xf32>
    %c0_5 = arith.constant 0 : index
    %c0_6 = arith.constant 0 : index
    %8 = vector.load %arg4[%c0_5, %c0_6] : memref<32x128xf32, #tpu.memory_space<vmem>>, vector<32x128xf32>
    tpu.vector_store %arg4[%c0_5, %c0_6], %7 {strides = array<i32>} : memref<32x128xf32, #tpu.memory_space<vmem>>, vector<32x128xf32>,
    return
  }
  func.func @transform_0(%arg0: i32) -> (i32, i32) {
    %c0_i32 = arith.constant 0 : i32
    %c0_i32_0 = arith.constant 0 : i32
    return %arg0, %c0_i32 : i32, i32
  }
  func.func @transform_1(%arg0: i32) -> (i32, i32) {
    %c0_i32 = arith.constant 0 : i32
    %c0_i32_0 = arith.constant 0 : i32
    %c0_i32_1 = arith.constant 0 : i32
    return %c0_i32, %c0_i32_0 : i32, i32
  }
  func.func @transform_2(%arg0: i32) -> (i32, i32) {
    %c0_i32 = arith.constant 0 : i32
    %c0_i32_0 = arith.constant 0 : i32
    %c0_i32_1 = arith.constant 0 : i32
    return %c0_i32, %c0_i32_0 : i32, i32
  }
  func.func @transform_3(%arg0: i32) -> (i32, i32) {
    %c0_i32 = arith.constant 0 : i32
    %c0_i32_0 = arith.constant 0 : i32
    return %arg0, %c0_i32 : i32, i32
  }
}

</mosaic_0001>

<bundles_post_ra>
// kernel: pool_aggregator_forward.3
= control target key start
LH: loop header
LB: loop body
LE: loop exit
PB: predicated region body
PF: predicated region fallthrough
CT: control target
= control target key end

     0   :  { %s322_s12 = smov 0   ;;  %s345_s0 = inlined_call_operand.vmem [shape: bf16[60,128], index: 0, kind: input, shape index: {}]   ;;  %s346_s1 = inlined_call_operand.vmem [shape: f32[1,128], index: 1, kind: input, shape index: {}]   ;;  %s347_s2 = inlined_call_operand.vmem [shape: f32[1,128], index: 2, kind: input, shape index: {}]   ;;  %s348_s3 = inlined_call_operand.vmem [shape: f32[60,128], index: 3, kind: output, shape index: {}]  }
   0x1 LB: > { %s264_s13 = sadd.s32 4294967295, %s300_s12   ;;  %p268_p0 = scmp.ge.s32.totalorder %s300_s12, 1  ;;  %s300_s12 = sphi %s322_s12, %s13_s12  }
   0x2   : > { %p138_p1 = scmp.lt.s32.totalorder %s300_s12, 3 }
   0x4   : > { %p139_p2 = pnand %p268_p0, %p138_p1 }
   0x5   : > { %s269_s14 = sshll.u32 (!%p139_p2), %s264_s13, 2 }
   0x6   : > { %142 = sbr.rel (%p139_p2) target bundleno = 23 (0x17), region = 32  ;;  %p163_p3 = scmp.lt.s32.totalorder (!%p139_p2), %s269_s14, 7 }
   0xb   : > { %s350_s14 = smov (!%p163_p3, %s269_s14), 7  ;;  %v273_v2 = vld [vmem:[%s346_s1] ss:$0 sm:$0xff] }
   0xc   : > { %s270_s15 = sshll.u32 %s350_s14, 2  ;;  %s272_s21 = sshll.u32 %s350_s14, 3  ;;  %v274_v7 = vld [vmem:[%s347_s2] ss:$0 sm:$0xff] }
   0xd   : > { %s166_s18 = scalar_lea.vmem %s345_s0, %s270_s15  ;;  %s172_s26 = scalar_lea.vmem %s348_s3, %s272_s21 }
   0xe   : > { %v278_v0 = vld [vmem:[%s166_s18] sm:$0xff]   ;;  %v285_v1 = vld [vmem:[%s166_s18 + $0x8] sm:$0xff]  }
   0xf   : > { %v279_v3 = vunpack.c.l.bf16 %v278_v0  ;;  %v280_v4 = vunpack.c.h.bf16 %v278_v0  ;;  %v283_v5 = vunpack.c.l.bf16 %v285_v1  ;;  %v284_v6 = vunpack.c.h.bf16 %v285_v1 }
  0x11   : > { %v189_v8 = vmul.f32 %v279_v3, %v273_v2  ;;  %v190_v9 = vmul.f32 %v280_v4, %v273_v2  ;;  %v191_v10 = vmul.f32 %v283_v5, %v273_v2  ;;  %v192_v11 = vmul.f32 %v284_v6, %v273_v2 }
  0x13   : > { %v200_v12 = vadd.f32 %v274_v7, %v189_v8  ;;  %v201_v13 = vadd.f32 %v274_v7, %v190_v9  ;;  %v202_v14 = vadd.f32 %v274_v7, %v191_v10  ;;  %v203_v15 = vadd.f32 %v274_v7, %v192_v11 }
  0x15   : > { %204 = vst [vmem:[%s172_s26] sm:$0xff] %v200_v12  ;;  %205 = vst [vmem:[%s172_s26 + $0x8] sm:$0xff] %v201_v13 }
  0x16   : > { %206 = vst [vmem:[%s172_s26 + $0x10] sm:$0xff] %v202_v14  ;;  %207 = vst [vmem:[%s172_s26 + $0x18] sm:$0xff] %v203_v15 }
  0x17 PF: > { %s13_s12 = sadd.s32 1, %s300_s12  }
  0x18   : > { %p10_p4 = scmp.ge.s32.totalorder %s13_s12, 4  }
  0x1a   :  { %12 = sbr.rel (!%p10_p4) target bundleno = 1 (0x1), region = 62 }

// kernel: pool_aggregator_forward.2
= control target key start
LH: loop header
LB: loop body
LE: loop exit
PB: predicated region body
PF: predicated region fallthrough
CT: control target
= control target key end

     0   :  { %s910_s21 = smov 0   ;;  %s1011_s0 = inlined_call_operand.vmem [shape: f32[60,256], index: 0, kind: input, shape index: {}]   ;;  %s1012_s1 = inlined_call_operand.vmem [shape: f32[60,32], index: 1, kind: input, shape index: {}]   ;;  %s1013_s2 = inlined_call_operand.vmem [shape: bf16[256,128], index: 2, kind: input, shape index: {}]   ;;  %s1014_s3 = inlined_call_operand.vmem [shape: bf16[32,128], index: 3, kind: input, shape index: {}]   ;;  %s1015_s4 = inlined_call_operand.vmem [shape: f32[1,128], index: 4, kind: input, shape index: {}]   ;;  %s1016_s5 = inlined_call_operand.vmem [shape: bf16[60,128], index: 5, kind: output, shape index: {0}]   ;;  %s1017_s6 = inlined_call_operand.vmem [shape: f32[2,2,128], index: 6, kind: output, shape index: {1}]  }
   0x1 LB: > { %s916_s22 = sadd.s32 4294967295, %s873_s21   ;;  %p748_p0 = scmp.ge.s32.totalorder %s873_s21, 1  ;;  %s873_s21 = sphi %s910_s21, %s17_s21  }
   0x2   : > { %p228_p1 = scmp.lt.s32.totalorder %s873_s21, 3 }
   0x4   : > { %p229_p2 = pnand %p748_p0, %p228_p1 }
   0x5   : > { %s749_s25 = sshll.u32 (!%p229_p2), %s916_s22, 2  ;;  %s782_s26 = sshll.u32 (!%p229_p2), %s916_s22, 5 }
   0x6   : > { %232 = sbr.rel (%p229_p2) target bundleno = 277 (0x115), region = 40  ;;  %p269_p3 = scmp.lt.s32.totalorder (!%p229_p2), %s749_s25, 7 }
   0x7   : > { %p287_p4 = scmp.lt.s32.totalorder (!%p229_p2), %s916_s22, 1 }
   0xb   : > { %v849_v0 = vld [vmem:[%s1013_s2 + $0x78] sm:$0xff]   ;;  %v851_v2 = vld [vmem:[%s1013_s2 + $0x70] sm:$0xff]   ;;  %v853_v4 = vld [vmem:[%s1013_s2 + $0x68] sm:$0xff]   ;;  %s1019_s25 = smov (!%p269_p3, %s749_s25), 7  ;;  %vm358_vm0 = vcmask 261120   ;;  %v595_v37 = vlaneseq  ;;  %v600_v49 = vstv %s782_s26  ;;  %s1021_s22 = smov (!%p287_p4, %s916_s22), 1 }
   0xc   : > { %v850_v1 = vld [vmem:[%s1013_s2 + $0x38] sm:$0xff]   ;;  %805 = vmatprep.subr.bf16.mxu1 %v849_v0  ;;  %v852_v3 = vld [vmem:[%s1013_s2 + $0x30] sm:$0xff]   ;;  %v854_v5 = vld [vmem:[%s1013_s2 + $0x28] sm:$0xff]   ;;  %s785_s18 = sshll.u32 %s1019_s25, 4  ;;  %s753_s23 = sshll.u32 %s1019_s25, 3 }
   0xd   : > { %806 = vmatpush3.bf16.msra.mxu1 %v850_v1  ;;  %v855_v6 = vld [vmem:[%s1013_s2 + $0x60] sm:$0xff]   ;;  %v857_v8 = vld [vmem:[%s1013_s2 + $0x58] sm:$0xff]   ;;  %v861_v9 = vld [vmem:[%s1014_s3 + $0x8] sm:$0xff]   ;;  %s964_s7 = scalar_lea.vmem %s1011_s0, %s785_s18  ;;  %s279_s10 = scalar_lea.vmem %s1012_s1, %s753_s23  ;;  %v596_v41 = vshrl.u32 %v595_v37, 7 }
   0xe   : > { %807 = vmatprep.subr.bf16.mxu1 %v851_v2  ;;  %v856_v7 = vld [vmem:[%s1013_s2 + $0x20] sm:$0xff]   ;;  %v858_v10 = vld [vmem:[%s1013_s2 + $0x18] sm:$0xff]   ;;  %833 = vmatprep.subr.bf16.mxu0 %v861_v9  ;;  %v859_v12 = vld [vmem:[%s1013_s2 + $0x50] sm:$0xff]   ;;  %s755_s29 = sshll.u32 %s1019_s25, 2  ;;  %s756_s25 = sshll.u32 %s1021_s22, 1 }
   0xf   : > { %834 = vmatpush3.bf16.msra.mxu0 %v861_v9  ;;  %v864_v11 = vld [vmem:[%s1014_s3] sm:$0xff]   ;;  %v860_v13 = vld [vmem:[%s1013_s2 + $0x10] sm:$0xff]   ;;  %v305_v15 = vld [vmem:[%s279_s10 + $0x8] sm:$0xff]  ;;  %v597_v45 = vadd.s32 8, %v596_v41  ;;  %v598_v54 = vadd.s32 16, %v596_v41  ;;  %v601_v57 = vadd.s32 %v600_v49, %v596_v41  ;;  %v599_v63 = vadd.s32 24, %v596_v41  ;;  %s285_s8 = scalar_lea.vmem %s1016_s5, %s755_s29  ;;  %s290_s11 = scalar_lea.vmem %s1017_s6, %s756_s25 }
  0x10   : > { %835 = vmatprep.subr.bf16.mxu0 %v864_v11  ;;  %v304_v14 = vld [vmem:[%s279_s10] sm:$0xff]  ;;  %v293_v16 = vld [vmem:[%s964_s7 + $0x8] sm:$0xff]  ;;  %v295_v18 = vld [vmem:[%s964_s7 + $0x18] sm:$0xff] }
  0x11   : > { %808 = vmatpush3.bf16.msra.mxu1 %v852_v3  ;;  %v308_v17 = vpack.c.bf16 %v305_v15, %v304_v14  ;;  %v306_v19 = vld [vmem:[%s279_s10 + $0x10] sm:$0xff]  ;;  %v307_v20 = vld [vmem:[%s279_s10 + $0x18] sm:$0xff]  ;;  %v862_v21 = vld [vmem:[%s1013_s2 + $0x48] sm:$0xff]   ;;  %v301_v22 = vpack.c.bf16 %v295_v18, %v293_v16  ;;  %v602_v52 = vadd.s32 %v600_v49, %v597_v45  ;;  %v603_v61 = vadd.s32 %v600_v49, %v598_v54 }
  0x12   : > { %809 = vmatprep.subr.bf16.mxu1 %v853_v4  ;;  %v309_v23 = vpack.c.bf16 %v307_v20, %v306_v19  ;;  %v863_v24 = vld [vmem:[%s1013_s2 + $0x8] sm:$0xff]   ;;  %v865_v25 = vld [vmem:[%s1013_s2 + $0x40] sm:$0xff]   ;;  %v294_v28 = vld [vmem:[%s964_s7 + $0x10] sm:$0xff]  ;;  %vm605_vm2 = vcmp.lt.s32.totalorder %v601_v57, 60 }
  0x13   : > { %836 = vmatpush3.bf16.msra.mxu0 %v864_v11  ;;  %837 = vmatprep.mubr.msk.bf16.mxu0 %vm358_vm0, %v308_v17  ;;  %v866_v26 = vld [vmem:[%s1013_s2] sm:$0xff]   ;;  %v297_v29 = vld [vmem:[%s964_s7 + $0x28] sm:$0xff]  ;;  %v299_v30 = vld [vmem:[%s964_s7 + $0x38] sm:$0xff]  ;;  %vm606_vm1 = vcmp.lt.s32.totalorder %v602_v52, 60  ;;  %vm607_vm3 = vcmp.lt.s32.totalorder %v603_v61, 60 }
  0x14   : > { %542 = vmatprep.mubr.bf16.mxu1 %v301_v22  ;;  %v292_v27 = vld [vmem:[%s964_s7] sm:$0xff]  ;;  %v303_v32 = vpack.c.bf16 %v299_v30, %v297_v29  ;;  %v298_v34 = vld [vmem:[%s964_s7 + $0x30] sm:$0xff] }
  0x15   : > { %810 = vmatpush3.bf16.msra.mxu1 %v854_v5  ;;  %v300_v31 = vpack.c.bf16 %v294_v28, %v292_v27  ;;  %v296_v33 = vld [vmem:[%s964_s7 + $0x20] sm:$0xff] }
  0x16   : > { %811 = vmatprep.subr.bf16.mxu1 %v855_v6  ;;  %838 = vmatmul.mubr.msk.bf16.vlgmr.msra.gmra.mxu0 %vm358_vm0, %v309_v23  ;;  %v302_v35 = vpack.c.bf16 %v298_v34, %v296_v33  ;;  %v777_v47 = vld [vmem:[%s1015_s4] ss:$0 sm:$0xff] }
  0x19   : > { %812 = vmatpush3.bf16.msra.mxu1 %v856_v7 }
  0x1a   : > { %813 = vmatprep.subr.bf16.mxu1 %v857_v8  ;;  %v604_v8 = vadd.s32 %v600_v49, %v599_v63 }
  0x1c   : > { %vm608_vm4 = vcmp.lt.s32.totalorder %v604_v8, 60 }
  0x1d   : > { %814 = vmatpush3.bf16.msra.mxu1 %v858_v10 }
  0x1e   : > { %815 = vmatprep.subr.bf16.mxu1 %v859_v12 }
  0x21   : > { %816 = vmatpush3.bf16.msra.mxu1 %v860_v13 }
  0x22   : > { %817 = vmatprep.subr.bf16.mxu1 %v862_v21 }
  0x25   : > { %818 = vmatpush3.bf16.msra.mxu1 %v863_v24 }
  0x26   : > { %819 = vmatprep.subr.bf16.mxu1 %v865_v25 }
  0x29   : > { %820 = vmatpush3.bf16.msra.mxu1 %v866_v26 }
  0x2c   : > { %543 = vmatmul.mubr.bf16.vlgmr.msra.gmra.mxu1 %v300_v31 }
  0x2d   : > { %550 = vmatprep.mubr.bf16.mxu1 %v303_v32 }
  0x34   : > { %551 = vmatmul.mubr.bf16.gmra.mxu1 %v302_v35 }
  0xd6   : > { %v839_v36 = vpop.f32.mrf.mxu0 }
  0xd8   : > { %v399_v39 = vpop.f32.mrf.mxu0 }
  0xda   : > { %v840_v43 = vpop.f32.mrf.mxu0 }
  0xdc   : > { %v402_v51 = vpop.f32.mrf.mxu0 }
  0xec   : > { %v821_v38 = vpop.f32.mrf.mxu1 }
  0xee   : > { %v822_v40 = vpop.f32.mrf.mxu1 }
  0xef   : > { %v823_v42 = vadd.f32 %v822_v40, %v821_v38 }
  0xf0   : > { %v824_v44 = vpop.f32.mrf.mxu1 }
  0xf1   : > { %v545_v46 = vadd.f32 %v823_v42, %v399_v39 }
  0xf2   : > { %v825_v48 = vpop.f32.mrf.mxu1 }
  0xf3   : > { %v826_v50 = vadd.f32 %v825_v48, %v824_v44  ;;  %v566_v55 = vadd.f32 %v777_v47, %v545_v46 }
  0xf4   : > { %v827_v53 = vpop.f32.mrf.mxu1 }
  0xf5   : > { %v548_v56 = vadd.f32 %v826_v50, %v402_v51  ;;  %v570_v0 = vmax.f32 %v566_v55, 0.0 }
  0xf6   : > { %v828_v58 = vpop.f32.mrf.mxu1 }
  0xf7   : > { %v567_v59 = vadd.f32 %v777_v47, %v548_v56  ;;  %v829_v60 = vadd.f32 %v828_v58, %v827_v53  ;;  %v617_v9 = vsel %vm605_vm2, %v570_v0, 0.0 }
  0xf8   : > { %v830_v62 = vpop.f32.mrf.mxu1  ;;  %v630_v15 = vmul.f32 %v617_v9, %v617_v9 }
  0xf9   : > { %v571_v1 = vmax.f32 %v567_v59, 0.0  ;;  %v553_v2 = vadd.f32 %v839_v36, %v829_v60 }
  0xfa   : > { %v831_v3 = vpop.f32.mrf.mxu1 }
  0xfb   : > { %v793_v4 = vpack.c.bf16 %v571_v1, %v570_v0  ;;  %v618_v5 = vsel %vm606_vm1, %v571_v1, 0.0  ;;  %v568_v6 = vadd.f32 %v777_v47, %v553_v2  ;;  %v832_v7 = vadd.f32 %v831_v3, %v830_v62 }
  0xfc   : > { %v631_v12 = vmul.f32 %v618_v5, %v618_v5  ;;  %v621_v16 = vadd.f32 %v618_v5, %v617_v9 }
  0xfd   : > { %794 = vst [vmem:[%s285_s8] sm:$0xff] %v793_v4   ;;  %v572_v10 = vmax.f32 %v568_v6, 0.0  ;;  %v556_v11 = vadd.f32 %v840_v43, %v832_v7 }
  0xfe   : > { %v634_v19 = vadd.f32 %v631_v12, %v630_v15 }
  0xff   : > { %v619_v13 = vsel %vm607_vm3, %v572_v10, 0.0  ;;  %v569_v14 = vadd.f32 %v777_v47, %v556_v11 }
 0x100   : > { %v632_v17 = vmul.f32 %v619_v13, %v619_v13  ;;  %v622_v20 = vadd.f32 %v621_v16, %v619_v13 }
 0x101   : > { %v573_v18 = vmax.f32 %v569_v14, 0.0 }
 0x102   : > { %v635_v23 = vadd.f32 %v634_v19, %v632_v17 }
 0x103   : > { %v798_v21 = vpack.c.bf16 %v573_v18, %v572_v10  ;;  %v620_v22 = vsel %vm608_vm4, %v573_v18, 0.0 }
 0x104   : > { %v623_v24 = vadd.f32 %v622_v20, %v620_v22  ;;  %v633_v25 = vmul.f32 %v620_v22, %v620_v22 }
 0x105   : > { %800 = vst [vmem:[%s285_s8 + $0x8] sm:$0xff] %v798_v21  }
 0x106   : > { %v624_v26 = vrot.slane %v623_v24, 4  ;;  %v636_v27 = vadd.f32 %v635_v23, %v633_v25 }
 0x108   : > { %v625_v28 = vadd.f32 %v624_v26, %v623_v24  ;;  %v637_v29 = vrot.slane %v636_v27, 4 }
 0x10a   : > { %v626_v30 = vrot.slane %v625_v28, 2  ;;  %v638_v31 = vadd.f32 %v637_v29, %v636_v27 }
 0x10c   : > { %v627_v32 = vadd.f32 %v626_v30, %v625_v28  ;;  %v639_v33 = vrot.slane %v638_v31, 2 }
 0x10e   : > { %v628_v34 = vrot.slane %v627_v32, 1  ;;  %v640_v35 = vadd.f32 %v639_v33, %v638_v31 }
 0x110   : > { %v629_v36 = vadd.f32 %v628_v34, %v627_v32  ;;  %v641_v37 = vrot.slane %v640_v35, 1 }
 0x112   : > { %v642_v38 = vadd.f32 %v641_v37, %v640_v35  ;;  %643 = vst [vmem:[%s290_s11] sm:$0x1] %v629_v36 }
 0x114   : > { %644 = vst [vmem:[%s290_s11 + $0x1] sm:$0x1] %v642_v38 }
 0x115 PF: > { %s17_s21 = sadd.s32 1, %s873_s21  }
 0x116   : > { %p14_p5 = scmp.ge.s32.totalorder %s17_s21, 4  }
 0x118   :  { %16 = sbr.rel (!%p14_p5) target bundleno = 1 (0x1), region = 85 }

</bundles_post_ra>
